<compile_context>
chip_gen: v5e
topology: v5e:2x2
jax: 0.10.0
libtpu: 0.0.40
codegen_flags: <defaults>
</compile_context>

<pallas_src>
import functools

import jax
import jax.numpy as jnp
from jax.experimental import pallas as pl
from jax.experimental.pallas import tpu as pltpu

EPS = 1e-5
APPROX_RECIPROCAL = True   # set False for exact-softmax parity tests


def _layernorm(x, g, b):
    mu = jnp.mean(x, axis=-1, keepdims=True)
    var = jnp.mean((x - mu) ** 2, axis=-1, keepdims=True)
    return (x - mu) * jax.lax.rsqrt(var + EPS) * g + b


def _softmax_rows(s):
    s = s - jnp.max(s, axis=-1, keepdims=True)
    p = jnp.exp(s)
    denom = jnp.sum(p, axis=-1, keepdims=True)
    if APPROX_RECIPROCAL:
        return p * pl.reciprocal(denom, approx=True)
    return p / denom


# --------------------------------------------------------------------------
# Kernel 1: the ENTIRE transformer stack in one pallas_call.
#   grid = (B // tb, L); layer axis l is innermost / "arbitrary".
#   Stacked weights are indexed by l -> next layer's weights prefetch while
#   the current layer computes.  Activation is carried across l in the
#   resident output block (o_ref): at l == 0 it is initialized from x (+ pos),
#   every step overwrites it; HBM writeback happens once per batch tile.
# --------------------------------------------------------------------------
def _stack_kernel(num_heads, tb, S, D,
                  x_ref, pos_ref, ln1g_ref, ln1b_ref, wqkv_ref, bqkv_ref,
                  wout_ref, bout_ref, ln2g_ref, ln2b_ref, w1_ref, b1_ref,
                  w2_ref, b2_ref, o_ref):
    H = num_heads
    dh = D // H
    M = tb * S
    scale = dh ** -0.5
    l = pl.program_id(1)

    @pl.when(l == 0)
    def _():
        # fuse the positional-embedding add into the first layer step
        o_ref[...] = x_ref[...] + pos_ref[...][None]

    x = o_ref[...].astype(jnp.float32)                        # (tb, S, D) f32 carrier

    # ---- causal multi-head self-attention ----
    h = _layernorm(x, ln1g_ref[...], ln1b_ref[...])
    h2 = h.reshape(M, D).astype(jnp.bfloat16)
    qkv = jnp.dot(h2, wqkv_ref[...],
                  preferred_element_type=jnp.float32) + bqkv_ref[...]   # (M, 3D) f32

    # causal additive mask built in-kernel (no (S, S) input DMA)
    rows = jax.lax.broadcasted_iota(jnp.int32, (S, S), 0)
    cols = jax.lax.broadcasted_iota(jnp.int32, (S, S), 1)
    mask = jnp.where(cols > rows, jnp.float32(-1e9), jnp.float32(0.0))

    # head-batched attention: all tb*H score / p@v matmuls issue as one
    # batched contraction; softmax/exp run once over the whole head batch.
    q_h, k_h, v_h = [], [], []
    for hd in range(H):                                       # cheap static slices
        q_h.append((qkv[:, hd * dh:(hd + 1) * dh] * scale).reshape(tb, S, dh))
        k_h.append(qkv[:, D + hd * dh:D + (hd + 1) * dh].reshape(tb, S, dh))
        v_h.append(qkv[:, 2 * D + hd * dh:2 * D + (hd + 1) * dh].reshape(tb, S, dh))
    qh = jnp.concatenate(q_h, axis=0).astype(jnp.bfloat16)    # (H*tb, S, dh)
    kh = jnp.concatenate(k_h, axis=0).astype(jnp.bfloat16)
    vh = jnp.concatenate(v_h, axis=0).astype(jnp.bfloat16)

    s = jnp.einsum("bqd,bkd->bqk", qh, kh,
                   preferred_element_type=jnp.float32)        # (H*tb, S, S) f32
    s = s + mask[None]
    p = _softmax_rows(s)
    oh = jnp.einsum("bqk,bkd->bqd", p.astype(jnp.bfloat16), vh,
                    preferred_element_type=jnp.float32)       # (H*tb, S, dh)

    attn = jnp.concatenate(
        [oh[hd * tb:(hd + 1) * tb].reshape(M, dh) for hd in range(H)], axis=-1)
    attn = jnp.dot(attn.astype(jnp.bfloat16), wout_ref[...],
                   preferred_element_type=jnp.float32) + bout_ref[...]  # (M, D)
    x = x + attn.reshape(tb, S, D)

    # ---- MLP with QuickGELU (CLIP) ----
    h2n = _layernorm(x, ln2g_ref[...], ln2b_ref[...]).reshape(M, D)
    m = jnp.dot(h2n.astype(jnp.bfloat16), w1_ref[...],
                preferred_element_type=jnp.float32) + b1_ref[...]
    m = m * jax.nn.sigmoid(1.702 * m)
    m = jnp.dot(m.astype(jnp.bfloat16), w2_ref[...],
                preferred_element_type=jnp.float32) + b2_ref[...]
    o_ref[...] = (x + m.reshape(tb, S, D)).astype(o_ref.dtype)


def _choose_tb(B, S):
    """Batch tile: fatten the matmul M dim while keeping >= 2 grid steps."""
    divisors = [d for d in range(1, B + 1) if B % d == 0]
    cands = [d for d in divisors if B // d >= 2]
    if not cands:
        return B                      # B == 1: nothing to split
    for d in cands:
        if d * S >= 256:              # fills the 256-wide MXU M dim (v6e/v7x)
            return d
    return cands[-1]                  # largest tile that keeps >= 2 grid steps


def _vmem_limit_bytes(tb, S, D, H, F):
    """Conservative per-call VMEM estimate; capped below v7x's 64 MiB."""
    m = tb * S
    wts = (3 * D * D + D * D + 2 * D * F) * 2               # bf16 per-layer weights
    small = (S * D + 8 * D + 2 * F) * 4                     # pos + biases + ln params
    act = m * D * 4                                         # one activation tile f32
    tmp = (m * 3 * D + m * F + 8 * m * D) * 4 + (H * tb * S * S) * 8 \
        + (m * 3 * D + m * F) * 2
    est = 2 * wts + 2 * small + 4 * act + 2 * tmp           # double-buffer + margin
    return int(min(max(est, 32 << 20), 56 << 20))


def transformer_stack(x, params, num_heads, tb, vmem_limit):
    B, S, D = x.shape
    L, _, F = params["w1"].shape
    H = num_heads

    names = ["ln1_g", "ln1_b", "wqkv", "bqkv", "wout", "bout",
             "ln2_g", "ln2_b", "w1", "b1", "w2", "b2"]
    args = [x, params["pos"]]
    in_specs = [
        pl.BlockSpec((tb, S, D), lambda b, l: (b, 0, 0)),     # activations
        pl.BlockSpec((S, D), lambda b, l: (0, 0)),            # positional embedding
    ]
    for n in names:                                           # stacked (L, ...) weights
        a = params[n]
        args.append(a)
        in_specs.append(
            pl.BlockSpec((None,) + a.shape[1:], lambda b, l: (l, 0, 0)))

    dh = D // H
    flops = 2 * B * L * S * (4 * D * D + 2 * D * F) + 4 * B * L * H * S * S * dh
    bytes_acc = L * (4 * D * D + 2 * D * F) * 2 + 2 * B * S * D * 4
    transc = B * L * (S * F + H * S * S)

    kernel = functools.partial(_stack_kernel, num_heads, tb, S, D)
    return pl.pallas_call(
        kernel,
        out_shape=jax.ShapeDtypeStruct((B, S, D), jnp.float32),
        grid=(B // tb, L),
        in_specs=in_specs,
        out_specs=pl.BlockSpec((tb, S, D), lambda b, l: (b, 0, 0)),
        compiler_params=pltpu.CompilerParams(
            dimension_semantics=("parallel", "arbitrary"),
            vmem_limit_bytes=vmem_limit),
        cost_estimate=pl.CostEstimate(flops=int(flops),
                                      transcendentals=int(transc),
                                      bytes_accessed=int(bytes_acc)),
    )(*args)


# --------------------------------------------------------------------------
# Kernel 2: ln_final + text_projection on pre-gathered EOT rows (B, D),
# computed into a lane-dense (128-padded) output slab.
# --------------------------------------------------------------------------
def _final_kernel(x_ref, g_ref, b_ref, proj_ref, o_ref):
    x = x_ref[...].astype(jnp.float32)                        # (B, D)
    h = _layernorm(x, g_ref[...], b_ref[...])
    o_ref[...] = jnp.dot(h.astype(jnp.bfloat16), proj_ref[...],
                         preferred_element_type=jnp.float32).astype(o_ref.dtype)


def final_project(x_eot, ln_g, ln_b, proj):
    B, D = x_eot.shape
    P = proj.shape[1]
    P_pad = ((P + 127) // 128) * 128                          # lane-dense out slab
    proj_p = proj if P_pad == P else jnp.pad(proj, ((0, 0), (0, P_pad - P)))
    out = pl.pallas_call(
        _final_kernel,
        out_shape=jax.ShapeDtypeStruct((B, P_pad), jnp.float32),
        grid=(1,),
        in_specs=[pl.BlockSpec((B, D), lambda i: (0, 0)),
                  pl.BlockSpec(ln_g.shape, lambda i: (0, 0)),
                  pl.BlockSpec(ln_b.shape, lambda i: (0, 0)),
                  pl.BlockSpec((D, P_pad), lambda i: (0, 0))],
        out_specs=pl.BlockSpec((B, P_pad), lambda i: (0, 0)),
    )(x_eot, ln_g, ln_b, proj_p)
    return out[:, :P]


# --------------------------------------------------------------------------
# Full TextEncoder forward
# --------------------------------------------------------------------------
def text_encoder(x, tokenized_prompts, params):
    B, S, D = x.shape
    H = params["num_heads"]
    F = params["w1"].shape[2]
    tb = _choose_tb(B, S)
    vmem_limit = _vmem_limit_bytes(tb, S, D, H, F)
    x = transformer_stack(x, params, H, tb, vmem_limit)
    # TODO(synk): EOT argmax + row gather stays as JAX glue (could be fused via
    # PrefetchScalarGridSpec + a pl.Element row gather); projection is Pallas.
    eot = jnp.argmax(tokenized_prompts, axis=-1)
    x_eot = x[jnp.arange(B), eot]                             # (B, D)
    return final_project(x_eot, params["lnf_g"], params["lnf_b"],
                         params["proj"])


# --------------------------------------------------------------------------
# Deterministic synthetic parameters (per-layer weights stacked on axis 0,
# MXU weights stored in bf16).
# --------------------------------------------------------------------------
def init_params(key, S, D, num_heads, num_layers, proj_dim, ffn_mult=4):
    keys = jax.random.split(key, 6)
    std = 0.02
    wdt = jnp.bfloat16
    F = ffn_mult * D
    L = num_layers
    return {
        "num_heads": num_heads,
        "pos": std * jax.random.normal(keys[0], (S, D), jnp.float32),
        "lnf_g": jnp.ones((1, D), jnp.float32),
        "lnf_b": jnp.zeros((1, D), jnp.float32),
        "proj": (std * jax.random.normal(keys[1], (D, proj_dim),
                                         jnp.float32)).astype(wdt),
        "ln1_g": jnp.ones((L, 1, D), jnp.float32),
        "ln1_b": jnp.zeros((L, 1, D), jnp.float32),
        "wqkv": (std * jax.random.normal(keys[2], (L, D, 3 * D),
                                         jnp.float32)).astype(wdt),
        "bqkv": jnp.zeros((L, 1, 3 * D), jnp.float32),
        "wout": (std * jax.random.normal(keys[3], (L, D, D),
                                         jnp.float32)).astype(wdt),
        "bout": jnp.zeros((L, 1, D), jnp.float32),
        "ln2_g": jnp.ones((L, 1, D), jnp.float32),
        "ln2_b": jnp.zeros((L, 1, D), jnp.float32),
        "w1": (std * jax.random.normal(keys[4], (L, D, F),
                                       jnp.float32)).astype(wdt),
        "b1": jnp.zeros((L, 1, F), jnp.float32),
        "w2": (std * jax.random.normal(keys[5], (L, F, D),
                                       jnp.float32)).astype(wdt),
        "b2": jnp.zeros((L, 1, D), jnp.float32),
    }


# Pure-JAX f32 reference for correctness checking (same bf16-valued weights).
def reference_text_encoder(x, tokens, params):
    H = params["num_heads"]
    L = params["wqkv"].shape[0]
    B, S, D = x.shape
    dh = D // H
    f32 = jnp.float32
    x = x + params["pos"][None]
    mask = jnp.triu(jnp.full((S, S), -1e9, f32), k=1)
    for l in range(L):
        h = _layernorm(x, params["ln1_g"][l], params["ln1_b"][l])
        qkv = h @ params["wqkv"][l].astype(f32) + params["bqkv"][l]
        q, k, v = qkv[..., :D], qkv[..., D:2 * D], qkv[..., 2 * D:]
        q = q.reshape(B, S, H, dh).transpose(0, 2, 1, 3)
        k = k.reshape(B, S, H, dh).transpose(0, 2, 1, 3)
        v = v.reshape(B, S, H, dh).transpose(0, 2, 1, 3)
        scores = jnp.einsum("bhqd,bhkd->bhqk", q, k) * dh ** -0.5 + mask
        pr = jax.nn.softmax(scores, axis=-1)
        o = jnp.einsum("bhqk,bhkd->bhqd", pr, v)
        o = o.transpose(0, 2, 1, 3).reshape(B, S, D)
        x = x + o @ params["wout"][l].astype(f32) + params["bout"][l]
        h2 = _layernorm(x, params["ln2_g"][l], params["ln2_b"][l])
        m = h2 @ params["w1"][l].astype(f32) + params["b1"][l]
        m = m * jax.nn.sigmoid(1.702 * m)
        x = x + m @ params["w2"][l].astype(f32) + params["b2"][l]
    x = _layernorm(x, params["lnf_g"], params["lnf_b"])
    eot = jnp.argmax(tokens, axis=-1)
    sel = x[jnp.arange(B), eot]
    return sel @ params["proj"].astype(f32)


if __name__ == "__main__":
    B, S, D, H, L, P = 2, 8, 32, 4, 2, 32

    key = jax.random.PRNGKey(0)
    kx, kp, kt = jax.random.split(key, 3)

    # token embeddings (already embedded, as in CLIP's encode_text before +pos)
    x = 0.02 * jax.random.normal(kx, (B, S, D), jnp.float32)

    # tokenized prompts: start token, a few tokens, EOT (49407 = max) then pad.
    lens = jax.random.randint(kt, (B,), 2, S)
    pos_ids = jnp.arange(S)[None, :]
    tokens = jnp.where(pos_ids < lens[:, None], 1 + pos_ids, 0)
    tokens = jnp.where(pos_ids == lens[:, None], 49407, tokens).astype(jnp.int32)

    params = init_params(kp, S, D, H, L, P)

    out = jax.block_until_ready(text_encoder(x, tokens, params))
    ref = jax.block_until_ready(reference_text_encoder(x, tokens, params))

    assert out.shape == (B, P)
    max_err = float(jnp.max(jnp.abs(out - ref)))
    assert jnp.allclose(out, ref, atol=2e-2, rtol=2e-2), (
        f"mismatch vs reference (max |err|={max_err})")
    print("KERNEL_OK")
</pallas_src>

<mosaic_0001>
module attributes {stable_mosaic.version = 11 : i64} {
  func.func @_stack_kernel(%arg0: i32, %arg1: i32, %arg2: memref<1x8x32xf32, #tpu.memory_space<vmem>>, %arg3: memref<8x32xf32, #tpu.memory_space<vmem>>, %arg4: memref<1x1x32xf32, #tpu.memory_space<vmem>>, %arg5: memref<1x1x32xf32, #tpu.memory_space<vmem>>, %arg6: memref<1x32x96xbf16, #tpu.memory_space<vmem>>, %arg7: memref<1x1x96xf32, #tpu.memory_space<vmem>>, %arg8: memref<1x32x32xbf16, #tpu.memory_space<vmem>>, %arg9: memref<1x1x32xf32, #tpu.memory_space<vmem>>, %arg10: memref<1x1x32xf32, #tpu.memory_space<vmem>>, %arg11: memref<1x1x32xf32, #tpu.memory_space<vmem>>, %arg12: memref<1x32x128xbf16, #tpu.memory_space<vmem>>, %arg13: memref<1x1x128xf32, #tpu.memory_space<vmem>>, %arg14: memref<1x128x32xbf16, #tpu.memory_space<vmem>>, %arg15: memref<1x1x32xf32, #tpu.memory_space<vmem>>, %arg16: memref<1x8x32xf32, #tpu.memory_space<vmem>>) attributes {dimension_semantics = [#tpu.dimension_semantics<parallel>, #tpu.dimension_semantics<arbitrary>], iteration_bounds = array<i64: 2, 2>, scalar_prefetch = 0 : i64, scratch_operands = 0 : i64, tpu.core_type = #tpu.core_type<tc>, window_params = [{transform_indices = @transform_0, window_bounds = array<i64: 1, 8, 32>}, {pipeline_mode = #tpu.pipeline_mode<synchronous>, transform_indices = @transform_1, window_bounds = array<i64: 8, 32>}, {transform_indices = @transform_2, window_bounds = array<i64: 1, 1, 32>}, {transform_indices = @transform_3, window_bounds = array<i64: 1, 1, 32>}, {transform_indices = @transform_4, window_bounds = array<i64: 1, 32, 96>}, {transform_indices = @transform_5, window_bounds = array<i64: 1, 1, 96>}, {transform_indices = @transform_6, window_bounds = array<i64: 1, 32, 32>}, {transform_indices = @transform_7, window_bounds = array<i64: 1, 1, 32>}, {transform_indices = @transform_8, window_bounds = array<i64: 1, 1, 32>}, {transform_indices = @transform_9, window_bounds = array<i64: 1, 1, 32>}, {transform_indices = @transform_10, window_bounds = array<i64: 1, 32, 128>}, {transform_indices = @transform_11, window_bounds = array<i64: 1, 1, 128>}, {transform_indices = @transform_12, window_bounds = array<i64: 1, 128, 32>}, {transform_indices = @transform_13, window_bounds = array<i64: 1, 1, 32>}, {transform_indices = @transform_14, window_bounds = array<i64: 1, 8, 32>}]} {
    %c0_i32 = arith.constant 0 : i32
    %0 = arith.cmpi eq, %arg1, %c0_i32 : i32
    %1 = arith.extui %0 : i1 to i32
    %c0_i32_0 = arith.constant 0 : i32
    %2 = arith.cmpi ne, %1, %c0_i32_0 : i32
    scf.if %2 {
      %c0_67 = arith.constant 0 : index
      %c0_68 = arith.constant 0 : index
      %c0_69 = arith.constant 0 : index
      %176 = vector.load %arg2[%c0_67, %c0_68, %c0_69] : memref<1x8x32xf32, #tpu.memory_space<vmem>>, vector<1x8x32xf32>
      %c0_70 = arith.constant 0 : index
      %c0_71 = arith.constant 0 : index
      %177 = vector.load %arg3[%c0_70, %c0_71] : memref<8x32xf32, #tpu.memory_space<vmem>>, vector<8x32xf32>
      %178 = vector.shape_cast %177 : vector<8x32xf32> to vector<1x8x32xf32>
      %179 = arith.addf %176, %178 : vector<1x8x32xf32>
      %c0_72 = arith.constant 0 : index
      %c0_73 = arith.constant 0 : index
      %c0_74 = arith.constant 0 : index
      %180 = vector.load %arg16[%c0_72, %c0_73, %c0_74] : memref<1x8x32xf32, #tpu.memory_space<vmem>>, vector<1x8x32xf32>
      tpu.vector_store %arg16[%c0_72, %c0_73, %c0_74], %179 {strides = array<i32>} : memref<1x8x32xf32, #tpu.memory_space<vmem>>, vector<1x8x32xf32>,
    } else {
    }
    %c0 = arith.constant 0 : index
    %c0_1 = arith.constant 0 : index
    %c0_2 = arith.constant 0 : index
    %3 = vector.load %arg16[%c0, %c0_1, %c0_2] : memref<1x8x32xf32, #tpu.memory_space<vmem>>, vector<1x8x32xf32>
    %c0_3 = arith.constant 0 : index
    %c0_4 = arith.constant 0 : index
    %c0_5 = arith.constant 0 : index
    %4 = vector.load %arg4[%c0_3, %c0_4, %c0_5] : memref<1x1x32xf32, #tpu.memory_space<vmem>>, vector<1x1x32xf32>
    %5 = vector.shape_cast %4 : vector<1x1x32xf32> to vector<1x32xf32>
    %c0_6 = arith.constant 0 : index
    %c0_7 = arith.constant 0 : index
    %c0_8 = arith.constant 0 : index
    %6 = vector.load %arg5[%c0_6, %c0_7, %c0_8] : memref<1x1x32xf32, #tpu.memory_space<vmem>>, vector<1x1x32xf32>
    %7 = vector.shape_cast %6 : vector<1x1x32xf32> to vector<1x32xf32>
    %cst = arith.constant dense<0.000000e+00> : vector<1x8xf32>
    %8 = vector.multi_reduction <add>, %3, %cst [2] : vector<1x8x32xf32> to vector<1x8xf32>
    %9 = vector.shape_cast %8 : vector<1x8xf32> to vector<1x8x1xf32>
    %cst_9 = arith.constant 3.200000e+01 : f32
    %10 = vector.broadcast %cst_9 : f32 to vector<1x8x1xf32>
    %11 = arith.divf %9, %10 : vector<1x8x1xf32>
    %12 = vector.broadcast %11 : vector<1x8x1xf32> to vector<1x8x32xf32>
    %13 = arith.subf %3, %12 : vector<1x8x32xf32>
    %14 = arith.mulf %13, %13 : vector<1x8x32xf32>
    %cst_10 = arith.constant dense<0.000000e+00> : vector<1x8xf32>
    %15 = vector.multi_reduction <add>, %14, %cst_10 [2] : vector<1x8x32xf32> to vector<1x8xf32>
    %16 = vector.shape_cast %15 : vector<1x8xf32> to vector<1x8x1xf32>
    %cst_11 = arith.constant 3.200000e+01 : f32
    %17 = vector.broadcast %cst_11 : f32 to vector<1x8x1xf32>
    %18 = arith.divf %16, %17 : vector<1x8x1xf32>
    %19 = vector.broadcast %11 : vector<1x8x1xf32> to vector<1x8x32xf32>
    %20 = arith.subf %3, %19 : vector<1x8x32xf32>
    %cst_12 = arith.constant 9.99999974E-6 : f32
    %21 = vector.broadcast %cst_12 : f32 to vector<1x8x1xf32>
    %22 = arith.addf %18, %21 : vector<1x8x1xf32>
    %23 = math.rsqrt %22 : vector<1x8x1xf32>
    %24 = vector.broadcast %23 : vector<1x8x1xf32> to vector<1x8x32xf32>
    %25 = arith.mulf %20, %24 : vector<1x8x32xf32>
    %26 = vector.shape_cast %5 : vector<1x32xf32> to vector<1x1x32xf32>
    %27 = vector.broadcast %26 : vector<1x1x32xf32> to vector<1x8x32xf32>
    %28 = arith.mulf %25, %27 : vector<1x8x32xf32>
    %29 = vector.shape_cast %7 : vector<1x32xf32> to vector<1x1x32xf32>
    %30 = vector.broadcast %29 : vector<1x1x32xf32> to vector<1x8x32xf32>
    %31 = arith.addf %28, %30 : vector<1x8x32xf32>
    %32 = vector.shape_cast %31 : vector<1x8x32xf32> to vector<8x32xf32>
    %33 = arith.truncf %32 : vector<8x32xf32> to vector<8x32xbf16>
    %c0_13 = arith.constant 0 : index
    %c0_14 = arith.constant 0 : index
    %c0_15 = arith.constant 0 : index
    %34 = vector.load %arg6[%c0_13, %c0_14, %c0_15] : memref<1x32x96xbf16, #tpu.memory_space<vmem>>, vector<1x32x96xbf16>
    %35 = vector.shape_cast %34 : vector<1x32x96xbf16> to vector<32x96xbf16>
    %cst_16 = arith.constant dense<0.000000e+00> : vector<8x96xf32>
    %36 = tpu.matmul %33, %35, %cst_16 {dimension_numbers = #tpu.dot_dimension_numbers<[1], [0], [0], [1], [0, 0, 1, 1], [], []>} : vector<8x32xbf16>, vector<32x96xbf16>, vector<8x96xf32> -> vector<8x96xf32>
    %c0_17 = arith.constant 0 : index
    %c0_18 = arith.constant 0 : index
    %c0_19 = arith.constant 0 : index
    %37 = vector.load %arg7[%c0_17, %c0_18, %c0_19] : memref<1x1x96xf32, #tpu.memory_space<vmem>>, vector<1x1x96xf32>
    %38 = vector.shape_cast %37 : vector<1x1x96xf32> to vector<1x96xf32>
    %39 = vector.broadcast %38 : vector<1x96xf32> to vector<8x96xf32>
    %40 = arith.addf %36, %39 : vector<8x96xf32>
    %41 = tpu.iota {dimensions = array<i32: 0>} : vector<8x8xi32>
    %42 = tpu.iota {dimensions = array<i32: 1>} : vector<8x8xi32>
    %43 = arith.cmpi sgt, %42, %41 : vector<8x8xi32>
    %cst_20 = arith.constant -1.000000e+09 : f32
    %cst_21 = arith.constant 0.000000e+00 : f32
    %44 = vector.broadcast %cst_20 : f32 to vector<8x8xf32>
    %45 = vector.broadcast %cst_21 : f32 to vector<8x8xf32>
    %46 = arith.select %43, %44, %45 : vector<8x8xi1>, vector<8x8xf32>
    %47 = vector.extract_strided_slice %40 {offsets = [0, 0], sizes = [8, 8], strides = [1, 1]} : vector<8x96xf32> to vector<8x8xf32>
    %cst_22 = arith.constant 0.353553385 : f32
    %48 = vector.broadcast %cst_22 : f32 to vector<8x8xf32>
    %49 = arith.mulf %47, %48 : vector<8x8xf32>
    %50 = vector.shape_cast %49 : vector<8x8xf32> to vector<1x8x8xf32>
    %51 = vector.extract_strided_slice %40 {offsets = [0, 32], sizes = [8, 8], strides = [1, 1]} : vector<8x96xf32> to vector<8x8xf32>
    %52 = vector.shape_cast %51 : vector<8x8xf32> to vector<1x8x8xf32>
    %53 = vector.extract_strided_slice %40 {offsets = [0, 64], sizes = [8, 8], strides = [1, 1]} : vector<8x96xf32> to vector<8x8xf32>
    %54 = vector.shape_cast %53 : vector<8x8xf32> to vector<1x8x8xf32>
    %55 = vector.extract_strided_slice %40 {offsets = [0, 8], sizes = [8, 8], strides = [1, 1]} : vector<8x96xf32> to vector<8x8xf32>
    %cst_23 = arith.constant 0.353553385 : f32
    %56 = vector.broadcast %cst_23 : f32 to vector<8x8xf32>
    %57 = arith.mulf %55, %56 : vector<8x8xf32>
    %58 = vector.shape_cast %57 : vector<8x8xf32> to vector<1x8x8xf32>
    %59 = vector.extract_strided_slice %40 {offsets = [0, 40], sizes = [8, 8], strides = [1, 1]} : vector<8x96xf32> to vector<8x8xf32>
    %60 = vector.shape_cast %59 : vector<8x8xf32> to vector<1x8x8xf32>
    %61 = vector.extract_strided_slice %40 {offsets = [0, 72], sizes = [8, 8], strides = [1, 1]} : vector<8x96xf32> to vector<8x8xf32>
    %62 = vector.shape_cast %61 : vector<8x8xf32> to vector<1x8x8xf32>
    %63 = vector.extract_strided_slice %40 {offsets = [0, 16], sizes = [8, 8], strides = [1, 1]} : vector<8x96xf32> to vector<8x8xf32>
    %cst_24 = arith.constant 0.353553385 : f32
    %64 = vector.broadcast %cst_24 : f32 to vector<8x8xf32>
    %65 = arith.mulf %63, %64 : vector<8x8xf32>
    %66 = vector.shape_cast %65 : vector<8x8xf32> to vector<1x8x8xf32>
    %67 = vector.extract_strided_slice %40 {offsets = [0, 48], sizes = [8, 8], strides = [1, 1]} : vector<8x96xf32> to vector<8x8xf32>
    %68 = vector.shape_cast %67 : vector<8x8xf32> to vector<1x8x8xf32>
    %69 = vector.extract_strided_slice %40 {offsets = [0, 80], sizes = [8, 8], strides = [1, 1]} : vector<8x96xf32> to vector<8x8xf32>
    %70 = vector.shape_cast %69 : vector<8x8xf32> to vector<1x8x8xf32>
    %71 = vector.extract_strided_slice %40 {offsets = [0, 24], sizes = [8, 8], strides = [1, 1]} : vector<8x96xf32> to vector<8x8xf32>
    %cst_25 = arith.constant 0.353553385 : f32
    %72 = vector.broadcast %cst_25 : f32 to vector<8x8xf32>
    %73 = arith.mulf %71, %72 : vector<8x8xf32>
    %74 = vector.shape_cast %73 : vector<8x8xf32> to vector<1x8x8xf32>
    %75 = vector.extract_strided_slice %40 {offsets = [0, 56], sizes = [8, 8], strides = [1, 1]} : vector<8x96xf32> to vector<8x8xf32>
    %76 = vector.shape_cast %75 : vector<8x8xf32> to vector<1x8x8xf32>
    %77 = vector.extract_strided_slice %40 {offsets = [0, 88], sizes = [8, 8], strides = [1, 1]} : vector<8x96xf32> to vector<8x8xf32>
    %78 = vector.shape_cast %77 : vector<8x8xf32> to vector<1x8x8xf32>
    %79 = tpu.concatenate %50, %58, %66, %74 in 0 : vector<1x8x8xf32>, vector<1x8x8xf32>, vector<1x8x8xf32>, vector<1x8x8xf32> -> vector<4x8x8xf32>
    %80 = arith.truncf %79 : vector<4x8x8xf32> to vector<4x8x8xbf16>
    %81 = tpu.concatenate %52, %60, %68, %76 in 0 : vector<1x8x8xf32>, vector<1x8x8xf32>, vector<1x8x8xf32>, vector<1x8x8xf32> -> vector<4x8x8xf32>
    %82 = arith.truncf %81 : vector<4x8x8xf32> to vector<4x8x8xbf16>
    %83 = tpu.concatenate %54, %62, %70, %78 in 0 : vector<1x8x8xf32>, vector<1x8x8xf32>, vector<1x8x8xf32>, vector<1x8x8xf32> -> vector<4x8x8xf32>
    %84 = arith.truncf %83 : vector<4x8x8xf32> to vector<4x8x8xbf16>
    "tpu.trace_start"() <{level = 10 : i32, message = "bqd,bkd->bqk"}> : () -> ()
    %cst_26 = arith.constant dense<0.000000e+00> : vector<4x8x8xf32>
    %85 = tpu.matmul %80, %82, %cst_26 {dimension_numbers = #tpu.dot_dimension_numbers<[2], [2], [1], [1], [0, 0, 0, 1, 1, 1], [0], [0]>} : vector<4x8x8xbf16>, vector<4x8x8xbf16>, vector<4x8x8xf32> -> vector<4x8x8xf32>
    "tpu.trace_stop"() : () -> ()
    %86 = vector.shape_cast %46 : vector<8x8xf32> to vector<1x8x8xf32>
    %87 = vector.broadcast %86 : vector<1x8x8xf32> to vector<4x8x8xf32>
    %88 = arith.addf %85, %87 : vector<4x8x8xf32>
    %cst_27 = arith.constant dense<0xFF800000> : vector<4x8xf32>
    %89 = vector.multi_reduction <maximumf>, %88, %cst_27 [2] : vector<4x8x8xf32> to vector<4x8xf32>
    %90 = vector.shape_cast %89 : vector<4x8xf32> to vector<4x8x1xf32>
    %91 = vector.broadcast %90 : vector<4x8x1xf32> to vector<4x8x8xf32>
    %92 = arith.subf %88, %91 : vector<4x8x8xf32>
    %93 = math.exp %92 : vector<4x8x8xf32>
    %cst_28 = arith.constant dense<0.000000e+00> : vector<4x8xf32>
    %94 = vector.multi_reduction <add>, %93, %cst_28 [2] : vector<4x8x8xf32> to vector<4x8xf32>
    %95 = vector.shape_cast %94 : vector<4x8xf32> to vector<4x8x1xf32>
    %96 = tpu.reciprocal %95 {approx = true} : vector<4x8x1xf32> -> vector<4x8x1xf32>
    %97 = vector.broadcast %96 : vector<4x8x1xf32> to vector<4x8x8xf32>
    %98 = arith.mulf %93, %97 : vector<4x8x8xf32>
    %99 = arith.truncf %98 : vector<4x8x8xf32> to vector<4x8x8xbf16>
    "tpu.trace_start"() <{level = 10 : i32, message = "bqk,bkd->bqd"}> : () -> ()
    %cst_29 = arith.constant dense<0.000000e+00> : vector<4x8x8xf32>
    %100 = tpu.matmul %99, %84, %cst_29 {dimension_numbers = #tpu.dot_dimension_numbers<[2], [1], [1], [2], [0, 0, 0, 1, 1, 2], [0], [0]>} : vector<4x8x8xbf16>, vector<4x8x8xbf16>, vector<4x8x8xf32> -> vector<4x8x8xf32>
    "tpu.trace_stop"() : () -> ()
    %101 = vector.extract_strided_slice %100 {offsets = [0, 0, 0], sizes = [1, 8, 8], strides = [1, 1, 1]} : vector<4x8x8xf32> to vector<1x8x8xf32>
    %102 = vector.shape_cast %101 : vector<1x8x8xf32> to vector<8x8xf32>
    %103 = vector.extract_strided_slice %100 {offsets = [1, 0, 0], sizes = [1, 8, 8], strides = [1, 1, 1]} : vector<4x8x8xf32> to vector<1x8x8xf32>
    %104 = vector.shape_cast %103 : vector<1x8x8xf32> to vector<8x8xf32>
    %105 = vector.extract_strided_slice %100 {offsets = [2, 0, 0], sizes = [1, 8, 8], strides = [1, 1, 1]} : vector<4x8x8xf32> to vector<1x8x8xf32>
    %106 = vector.shape_cast %105 : vector<1x8x8xf32> to vector<8x8xf32>
    %107 = vector.extract_strided_slice %100 {offsets = [3, 0, 0], sizes = [1, 8, 8], strides = [1, 1, 1]} : vector<4x8x8xf32> to vector<1x8x8xf32>
    %108 = vector.shape_cast %107 : vector<1x8x8xf32> to vector<8x8xf32>
    %109 = tpu.concatenate %102, %104, %106, %108 in 1 : vector<8x8xf32>, vector<8x8xf32>, vector<8x8xf32>, vector<8x8xf32> -> vector<8x32xf32>
    %110 = arith.truncf %109 : vector<8x32xf32> to vector<8x32xbf16>
    %c0_30 = arith.constant 0 : index
    %c0_31 = arith.constant 0 : index
    %c0_32 = arith.constant 0 : index
    %111 = vector.load %arg8[%c0_30, %c0_31, %c0_32] : memref<1x32x32xbf16, #tpu.memory_space<vmem>>, vector<1x32x32xbf16>
    %112 = vector.shape_cast %111 : vector<1x32x32xbf16> to vector<32x32xbf16>
    %cst_33 = arith.constant dense<0.000000e+00> : vector<8x32xf32>
    %113 = tpu.matmul %110, %112, %cst_33 {dimension_numbers = #tpu.dot_dimension_numbers<[1], [0], [0], [1], [0, 0, 1, 1], [], []>} : vector<8x32xbf16>, vector<32x32xbf16>, vector<8x32xf32> -> vector<8x32xf32>
    %c0_34 = arith.constant 0 : index
    %c0_35 = arith.constant 0 : index
    %c0_36 = arith.constant 0 : index
    %114 = vector.load %arg9[%c0_34, %c0_35, %c0_36] : memref<1x1x32xf32, #tpu.memory_space<vmem>>, vector<1x1x32xf32>
    %115 = vector.shape_cast %114 : vector<1x1x32xf32> to vector<1x32xf32>
    %116 = vector.broadcast %115 : vector<1x32xf32> to vector<8x32xf32>
    %117 = arith.addf %113, %116 : vector<8x32xf32>
    %118 = vector.shape_cast %117 : vector<8x32xf32> to vector<1x8x32xf32>
    %119 = arith.addf %3, %118 : vector<1x8x32xf32>
    %c0_37 = arith.constant 0 : index
    %c0_38 = arith.constant 0 : index
    %c0_39 = arith.constant 0 : index
    %120 = vector.load %arg10[%c0_37, %c0_38, %c0_39] : memref<1x1x32xf32, #tpu.memory_space<vmem>>, vector<1x1x32xf32>
    %121 = vector.shape_cast %120 : vector<1x1x32xf32> to vector<1x32xf32>
    %c0_40 = arith.constant 0 : index
    %c0_41 = arith.constant 0 : index
    %c0_42 = arith.constant 0 : index
    %122 = vector.load %arg11[%c0_40, %c0_41, %c0_42] : memref<1x1x32xf32, #tpu.memory_space<vmem>>, vector<1x1x32xf32>
    %123 = vector.shape_cast %122 : vector<1x1x32xf32> to vector<1x32xf32>
    %cst_43 = arith.constant dense<0.000000e+00> : vector<1x8xf32>
    %124 = vector.multi_reduction <add>, %119, %cst_43 [2] : vector<1x8x32xf32> to vector<1x8xf32>
    %125 = vector.shape_cast %124 : vector<1x8xf32> to vector<1x8x1xf32>
    %cst_44 = arith.constant 3.200000e+01 : f32
    %126 = vector.broadcast %cst_44 : f32 to vector<1x8x1xf32>
    %127 = arith.divf %125, %126 : vector<1x8x1xf32>
    %128 = vector.broadcast %127 : vector<1x8x1xf32> to vector<1x8x32xf32>
    %129 = arith.subf %119, %128 : vector<1x8x32xf32>
    %130 = arith.mulf %129, %129 : vector<1x8x32xf32>
    %cst_45 = arith.constant dense<0.000000e+00> : vector<1x8xf32>
    %131 = vector.multi_reduction <add>, %130, %cst_45 [2] : vector<1x8x32xf32> to vector<1x8xf32>
    %132 = vector.shape_cast %131 : vector<1x8xf32> to vector<1x8x1xf32>
    %cst_46 = arith.constant 3.200000e+01 : f32
    %133 = vector.broadcast %cst_46 : f32 to vector<1x8x1xf32>
    %134 = arith.divf %132, %133 : vector<1x8x1xf32>
    %135 = vector.broadcast %127 : vector<1x8x1xf32> to vector<1x8x32xf32>
    %136 = arith.subf %119, %135 : vector<1x8x32xf32>
    %cst_47 = arith.constant 9.99999974E-6 : f32
    %137 = vector.broadcast %cst_47 : f32 to vector<1x8x1xf32>
    %138 = arith.addf %134, %137 : vector<1x8x1xf32>
    %139 = math.rsqrt %138 : vector<1x8x1xf32>
    %140 = vector.broadcast %139 : vector<1x8x1xf32> to vector<1x8x32xf32>
    %141 = arith.mulf %136, %140 : vector<1x8x32xf32>
    %142 = vector.shape_cast %121 : vector<1x32xf32> to vector<1x1x32xf32>
    %143 = vector.broadcast %142 : vector<1x1x32xf32> to vector<1x8x32xf32>
    %144 = arith.mulf %141, %143 : vector<1x8x32xf32>
    %145 = vector.shape_cast %123 : vector<1x32xf32> to vector<1x1x32xf32>
    %146 = vector.broadcast %145 : vector<1x1x32xf32> to vector<1x8x32xf32>
    %147 = arith.addf %144, %146 : vector<1x8x32xf32>
    %148 = vector.shape_cast %147 : vector<1x8x32xf32> to vector<8x32xf32>
    %149 = arith.truncf %148 : vector<8x32xf32> to vector<8x32xbf16>
    %c0_48 = arith.constant 0 : index
    %c0_49 = arith.constant 0 : index
    %c0_50 = arith.constant 0 : index
    %150 = vector.load %arg12[%c0_48, %c0_49, %c0_50] : memref<1x32x128xbf16, #tpu.memory_space<vmem>>, vector<1x32x128xbf16>
    %151 = vector.shape_cast %150 : vector<1x32x128xbf16> to vector<32x128xbf16>
    %cst_51 = arith.constant dense<0.000000e+00> : vector<8x128xf32>
    %152 = tpu.matmul %149, %151, %cst_51 {dimension_numbers = #tpu.dot_dimension_numbers<[1], [0], [0], [1], [0, 0, 1, 1], [], []>} : vector<8x32xbf16>, vector<32x128xbf16>, vector<8x128xf32> -> vector<8x128xf32>
    %c0_52 = arith.constant 0 : index
    %c0_53 = arith.constant 0 : index
    %c0_54 = arith.constant 0 : index
    %153 = vector.load %arg13[%c0_52, %c0_53, %c0_54] : memref<1x1x128xf32, #tpu.memory_space<vmem>>, vector<1x1x128xf32>
    %154 = vector.shape_cast %153 : vector<1x1x128xf32> to vector<1x128xf32>
    %155 = vector.broadcast %154 : vector<1x128xf32> to vector<8x128xf32>
    %156 = arith.addf %152, %155 : vector<8x128xf32>
    %cst_55 = arith.constant 1.702000e+00 : f32
    %157 = vector.broadcast %cst_55 : f32 to vector<8x128xf32>
    %158 = arith.mulf %157, %156 : vector<8x128xf32>
    %159 = arith.negf %158 : vector<8x128xf32>
    %160 = math.exp %159 : vector<8x128xf32>
    %cst_56 = arith.constant 1.000000e+00 : f32
    %161 = vector.broadcast %cst_56 : f32 to vector<8x128xf32>
    %162 = arith.addf %161, %160 : vector<8x128xf32>
    %163 = arith.divf %161, %162 : vector<8x128xf32>
    %164 = arith.mulf %156, %163 : vector<8x128xf32>
    %165 = arith.truncf %164 : vector<8x128xf32> to vector<8x128xbf16>
    %c0_57 = arith.constant 0 : index
    %c0_58 = arith.constant 0 : index
    %c0_59 = arith.constant 0 : index
    %166 = vector.load %arg14[%c0_57, %c0_58, %c0_59] : memref<1x128x32xbf16, #tpu.memory_space<vmem>>, vector<1x128x32xbf16>
    %167 = vector.shape_cast %166 : vector<1x128x32xbf16> to vector<128x32xbf16>
    %cst_60 = arith.constant dense<0.000000e+00> : vector<8x32xf32>
    %168 = tpu.matmul %165, %167, %cst_60 {dimension_numbers = #tpu.dot_dimension_numbers<[1], [0], [0], [1], [0, 0, 1, 1], [], []>} : vector<8x128xbf16>, vector<128x32xbf16>, vector<8x32xf32> -> vector<8x32xf32>
    %c0_61 = arith.constant 0 : index
    %c0_62 = arith.constant 0 : index
    %c0_63 = arith.constant 0 : index
    %169 = vector.load %arg15[%c0_61, %c0_62, %c0_63] : memref<1x1x32xf32, #tpu.memory_space<vmem>>, vector<1x1x32xf32>
    %170 = vector.shape_cast %169 : vector<1x1x32xf32> to vector<1x32xf32>
    %171 = vector.broadcast %170 : vector<1x32xf32> to vector<8x32xf32>
    %172 = arith.addf %168, %171 : vector<8x32xf32>
    %173 = vector.shape_cast %172 : vector<8x32xf32> to vector<1x8x32xf32>
    %174 = arith.addf %119, %173 : vector<1x8x32xf32>
    %c0_64 = arith.constant 0 : index
    %c0_65 = arith.constant 0 : index
    %c0_66 = arith.constant 0 : index
    %175 = vector.load %arg16[%c0_64, %c0_65, %c0_66] : memref<1x8x32xf32, #tpu.memory_space<vmem>>, vector<1x8x32xf32>
    tpu.vector_store %arg16[%c0_64, %c0_65, %c0_66], %174 {strides = array<i32>} : memref<1x8x32xf32, #tpu.memory_space<vmem>>, vector<1x8x32xf32>,
    return
  }
  func.func @transform_0(%arg0: i32, %arg1: i32) -> (i32, i32, i32) {
    %c0_i32 = arith.constant 0 : i32
    %c0_i32_0 = arith.constant 0 : i32
    %c0_i32_1 = arith.constant 0 : i32
    return %arg0, %c0_i32, %c0_i32_0 : i32, i32, i32
  }
  func.func @transform_1(%arg0: i32, %arg1: i32) -> (i32, i32) {
    %c0_i32 = arith.constant 0 : i32
    %c0_i32_0 = arith.constant 0 : i32
    %c0_i32_1 = arith.constant 0 : i32
    return %c0_i32, %c0_i32_0 : i32, i32
  }
  func.func @transform_2(%arg0: i32, %arg1: i32) -> (i32, i32, i32) {
    %c0_i32 = arith.constant 0 : i32
    %c0_i32_0 = arith.constant 0 : i32
    %c0_i32_1 = arith.constant 0 : i32
    return %arg1, %c0_i32, %c0_i32_0 : i32, i32, i32
  }
  func.func @transform_3(%arg0: i32, %arg1: i32) -> (i32, i32, i32) {
    %c0_i32 = arith.constant 0 : i32
    %c0_i32_0 = arith.constant 0 : i32
    %c0_i32_1 = arith.constant 0 : i32
    return %arg1, %c0_i32, %c0_i32_0 : i32, i32, i32
  }
  func.func @transform_4(%arg0: i32, %arg1: i32) -> (i32, i32, i32) {
    %c0_i32 = arith.constant 0 : i32
    %c0_i32_0 = arith.constant 0 : i32
    %c0_i32_1 = arith.constant 0 : i32
    return %arg1, %c0_i32, %c0_i32_0 : i32, i32, i32
  }
  func.func @transform_5(%arg0: i32, %arg1: i32) -> (i32, i32, i32) {
    %c0_i32 = arith.constant 0 : i32
    %c0_i32_0 = arith.constant 0 : i32
    %c0_i32_1 = arith.constant 0 : i32
    return %arg1, %c0_i32, %c0_i32_0 : i32, i32, i32
  }
  func.func @transform_6(%arg0: i32, %arg1: i32) -> (i32, i32, i32) {
    %c0_i32 = arith.constant 0 : i32
    %c0_i32_0 = arith.constant 0 : i32
    %c0_i32_1 = arith.constant 0 : i32
    return %arg1, %c0_i32, %c0_i32_0 : i32, i32, i32
  }
  func.func @transform_7(%arg0: i32, %arg1: i32) -> (i32, i32, i32) {
    %c0_i32 = arith.constant 0 : i32
    %c0_i32_0 = arith.constant 0 : i32
    %c0_i32_1 = arith.constant 0 : i32
    return %arg1, %c0_i32, %c0_i32_0 : i32, i32, i32
  }
  func.func @transform_8(%arg0: i32, %arg1: i32) -> (i32, i32, i32) {
    %c0_i32 = arith.constant 0 : i32
    %c0_i32_0 = arith.constant 0 : i32
    %c0_i32_1 = arith.constant 0 : i32
    return %arg1, %c0_i32, %c0_i32_0 : i32, i32, i32
  }
  func.func @transform_9(%arg0: i32, %arg1: i32) -> (i32, i32, i32) {
    %c0_i32 = arith.constant 0 : i32
    %c0_i32_0 = arith.constant 0 : i32
    %c0_i32_1 = arith.constant 0 : i32
    return %arg1, %c0_i32, %c0_i32_0 : i32, i32, i32
  }
  func.func @transform_10(%arg0: i32, %arg1: i32) -> (i32, i32, i32) {
    %c0_i32 = arith.constant 0 : i32
    %c0_i32_0 = arith.constant 0 : i32
    %c0_i32_1 = arith.constant 0 : i32
    return %arg1, %c0_i32, %c0_i32_0 : i32, i32, i32
  }
  func.func @transform_11(%arg0: i32, %arg1: i32) -> (i32, i32, i32) {
    %c0_i32 = arith.constant 0 : i32
    %c0_i32_0 = arith.constant 0 : i32
    %c0_i32_1 = arith.constant 0 : i32
    return %arg1, %c0_i32, %c0_i32_0 : i32, i32, i32
  }
  func.func @transform_12(%arg0: i32, %arg1: i32) -> (i32, i32, i32) {
    %c0_i32 = arith.constant 0 : i32
    %c0_i32_0 = arith.constant 0 : i32
    %c0_i32_1 = arith.constant 0 : i32
    return %arg1, %c0_i32, %c0_i32_0 : i32, i32, i32
  }
  func.func @transform_13(%arg0: i32, %arg1: i32) -> (i32, i32, i32) {
    %c0_i32 = arith.constant 0 : i32
    %c0_i32_0 = arith.constant 0 : i32
    %c0_i32_1 = arith.constant 0 : i32
    return %arg1, %c0_i32, %c0_i32_0 : i32, i32, i32
  }
  func.func @transform_14(%arg0: i32, %arg1: i32) -> (i32, i32, i32) {
    %c0_i32 = arith.constant 0 : i32
    %c0_i32_0 = arith.constant 0 : i32
    %c0_i32_1 = arith.constant 0 : i32
    return %arg0, %c0_i32, %c0_i32_0 : i32, i32, i32
  }
}

</mosaic_0001>

<bundles_post_ra>
// kernel: tpu_custom_call.1
= control target key start
LH: loop header
LB: loop body
LE: loop exit
PB: predicated region body
PF: predicated region fallthrough
CT: control target
= control target key end

     0   :  { %s2167_s0 = inlined_call_operand.vmem [shape: f32[2,8,32], index: 0, kind: input, shape index: {}]   ;;  %s2168_s1 = inlined_call_operand.vmem [shape: f32[8,32], index: 1, kind: input, shape index: {}]   ;;  %s2169_s2 = inlined_call_operand.vmem [shape: f32[2,1,32], index: 2, kind: input, shape index: {}]   ;;  %s2170_s3 = inlined_call_operand.vmem [shape: f32[2,1,32], index: 3, kind: input, shape index: {}]   ;;  %s2171_s4 = inlined_call_operand.vmem [shape: bf16[2,32,96], index: 4, kind: input, shape index: {}]   ;;  %s2172_s5 = inlined_call_operand.vmem [shape: f32[2,1,96], index: 5, kind: input, shape index: {}]   ;;  %s2173_s6 = inlined_call_operand.vmem [shape: bf16[2,32,32], index: 6, kind: input, shape index: {}]   ;;  %s2174_s7 = inlined_call_operand.vmem [shape: f32[2,1,32], index: 7, kind: input, shape index: {}]   ;;  %s2175_s8 = inlined_call_operand.vmem [shape: f32[2,1,32], index: 8, kind: input, shape index: {}]   ;;  %s2176_s9 = inlined_call_operand.vmem [shape: f32[2,1,32], index: 9, kind: input, shape index: {}]   ;;  %s2177_s10 = inlined_call_operand.vmem [shape: bf16[2,32,128], index: 10, kind: input, shape index: {}]   ;;  %s2178_s11 = inlined_call_operand.vmem [shape: f32[2,1,128], index: 11, kind: input, shape index: {}]   ;;  %s2179_s12 = inlined_call_operand.vmem [shape: bf16[2,128,32], index: 12, kind: input, shape index: {}]   ;;  %s2180_s13 = inlined_call_operand.vmem [shape: f32[2,1,32], index: 13, kind: input, shape index: {}]   ;;  %s2181_s14 = inlined_call_operand.hbm [shape: f32[2,8,32], index: 14, kind: output, shape index: {}]  }
   0x1   :  { %2197 = sst [smem:[#allocation18_spill]] %s2167_s0 }
   0x2   :  { %2198 = sst [smem:[#allocation19_spill]] %s2168_s1 }
   0x3   :  { %2199 = sst [smem:[#allocation20_spill]] %s2171_s4 }
   0x4   :  { %2200 = sst [smem:[#allocation21_spill]] %s2173_s6 }
   0x5   :  { %2201 = sst [smem:[#allocation22_spill]] %s2175_s8 }
   0x6   :  { %2202 = sst [smem:[#allocation23_spill]] %s2179_s12 }
   0x7   :  { %2203 = sst [smem:[#allocation24_spill]] %s2181_s14 }
   0x8   :  { %19 = vsyncpa [#allocation3], 0 }
   0x9   :  { %21 = vsyncpa [#allocation3 + $0x1], 0  ;;  %s1857_s29 = smov 0   ;;  %s1859_s30 = smov 0  }
   0xa   :  { %s1861_s15 = smov 0   ;;  %s1863_s16 = smov 0  }
   0xb   :  { %s1865_s17 = smov 0   ;;  %s1867_s18 = smov 0  }
   0xc   :  { %s1869_s19 = smov 0   ;;  %s1871_s20 = smov 0  }
   0xd LB: > { %2204 = sst [smem:[#allocation5_spill]] %s1742_s29  ;;  %s1455_s21 = sadd.s32 4294967295, %s1770_s20   ;;  %s1770_s20 = sphi %s1871_s20, %s27_s20   ;;  %s1766_s19 = sphi %s1869_s19, %s2247_s19   ;;  %s1762_s18 = sphi %s1867_s18, %s2246_s18   ;;  %s1758_s17 = sphi %s1865_s17, %s2245_s17   ;;  %s1754_s16 = sphi %s1863_s16, %s2244_s16   ;;  %s1750_s15 = sphi %s1861_s15, %s2243_s15   ;;  %s1746_s30 = sphi %s1859_s30, %s2242_s30   ;;  %s1742_s29 = sphi %s1857_s29, %s2241_s29  }
   0xe   : > { %2205 = sst [smem:[#allocation6_spill]] %s1746_s30  ;;  %s1456_s22 = sadd.s32 4294967294, %s1770_s20  }
   0xf   : > { %2206 = sst [smem:[#allocation7_spill]] %s1750_s15  ;;  %s36_s23 = sadd.s32 1, %s1762_s18 }
  0x10   : > { %2207 = sst [smem:[#allocation8_spill]] %s1754_s16  ;;  %p37_p0 = scmp.ge.s32.totalorder %s36_s23, 2 }
  0x11   : > { %2208 = sst [smem:[#allocation9_spill]] %s1758_s17  ;;  %s39_s24 = sadd.s32 1, %s1766_s19 }
  0x12   : > { %2209 = sst [smem:[#allocation10_spill]] %s1762_s18  ;;  %p415_p1 = scmp.ne.s32.totalorder %s1750_s15, %s1746_s30 }
  0x13   : > { %2210 = sst [smem:[#allocation11_spill]] %s1766_s19  ;;  %p416_p2 = scmp.eq.s32.totalorder %s1455_s21, 3 }
  0x14   : > { %2211 = sst [smem:[#allocation12_spill]] %s1770_s20  ;;  %s2249_s23 = smov (%p37_p0, %s36_s23), 0 }
  0x15   : > { %2212 = sst [smem:[#allocation13_spill]] %s2249_s23  ;;  %s2251_s24 = smov (!%p37_p0, %s39_s24), %s1766_s19 }
  0x16   : > { %p1906_p3 = por %p416_p2, %p415_p1  ;;  %p421_p4 = scmp.ne.s32.totalorder %s1746_s30, %s1742_s29 }
  0x17   : > { %p41_p5 = scmp.ge.s32.totalorder %s2251_s24, 2  ;;  %p422_p6 = scmp.eq.s32.totalorder %s1456_s22, 3 }
  0x18   : > { %s2213_s25 = scalar_select %p1906_p3, 1, 0 }
  0x19   : > { %p1459_p7 = scmp.ge.s32.totalorder %s1770_s20, 1  ;;  %p530_p8 = scmp.lt.s32.totalorder %s1770_s20, 5 }
  0x1a   : > { %2214 = sst [smem:[#allocation14_spill]] %s2213_s25  ;;  %s2253_s24 = smov (%p41_p5, %s2251_s24), 0 }
  0x1b   : > { %2215 = sst [smem:[#allocation15_spill]] %s2253_s24  ;;  %p1916_p9 = por %p422_p6, %p421_p4 }
  0x1c   : > { %p531_p10 = pnand %p1459_p7, %p530_p8  ;;  %s402_s27 = ssub.s32 %s1766_s19, %s2253_s24 }
  0x1d   : > { %s2216_s26 = scalar_select %p1916_p9, 1, 0 }
  0x1e   : > { %s405_s28 = sadd.s32 1, %s1750_s15  ;;  %p403_p11 = scmp.eq.s32.totalorder %s402_s27, 0 }
  0x1f   : > { %2217 = sst [smem:[#allocation16_spill]] %s2216_s26  ;;  %534 = sbr.rel (%p531_p10) target bundleno = 2054 (0x806), region = 76 }
  0x20   : > { %s1924_s21 = scalar_select %p403_p11, %s1750_s15, %s405_s28  }
  0x21   : > { %s2186_s22 = sand.u32 (!%p531_p10), 1, %s1746_s30   ;;  %p619_p12 = scmp.lt.s32.totalorder (!%p531_p10), %s1758_s17, 1 }
  0x22   : > { %2218 = sst [smem:[#allocation17_spill]] %s1924_s21  ;;  %s1460_s23 = sshll.u32 (!%p531_p10), %s2186_s22, 3 }
  0x23   : > { %p623_p13 = scmp.lt.s32.totalorder (!%p531_p10), %s1754_s16, 1  ;;  %s2219_s0 = sld [smem:[#allocation18_spill]] (!%p531_p10) }
  0x24   : > { %s620_s18 = scalar_select %p619_p12, %s1758_s17, 1 }
  0x25   : > { %s1933_s26 = scalar_select %p623_p13, %s1754_s16, 1 }
  0x26   : > { %s1461_s27 = sshll.u32 %s620_s18, 3  ;;  %s2220_s4 = sld [smem:[#allocation20_spill]] }
  0x27   : > { %s1543_s25 = sshll.u32 %s1933_s26, 4  ;;  %s2221_s6 = sld [smem:[#allocation21_spill]] }
  0x28   : > { %s1976_s18 = scalar_lea.vmem %s2177_s10, %s1543_s25  ;;  %s658_s12 = scalar_lea.vmem %s2178_s11, %s1933_s26 }
  0x29   : > { %s622_s19 = scalar_lea.vmem %s2219_s0, %s1461_s27  ;;  %s650_s0 = scalar_lea.vmem %s2176_s9, %s1933_s26 }
  0x2a   : > { %s666_s29 = scalar_lea.vmem %s2180_s13, %s1933_s26  ;;  %s2223_s15 = sld [smem:[#allocation23_spill]] }
  0x2b   : > { %s1992_s30 = scalar_lea.vmem [#allocation2], %s1460_s23  ;;  %s2224_s17 = sld [smem:[#allocation8_spill]] }
  0x2c   : > { %s1950_s1 = scalar_lea.vmem %s2220_s4, %s1543_s25 }
  0x2d   : > { %s1959_s28 = scalar_lea.vmem %s2221_s6, %s1543_s25  ;;  %s1546_s6 = sshll.u32 %s1933_s26, 6 }
  0x30   : > { %s1990_s8 = scalar_lea.vmem %s2223_s15, %s1546_s6 }
  0x31   : > { %p1470_p0 = scmp.ne.s32.totalorder %s2224_s17, 0 }
  0x32   : > { %s2225_s16 = sld [smem:[#allocation19_spill]] (!%p1470_p0) }
  0x33   : > { %671 = sbr.rel (%p1470_p0) target bundleno = 61 (0x3d), region = 80 }
  0x38   : > { %v672_v0 = vld [vmem:[%s622_s19] sm:$0xff]  ;;  %vm675_vm0 = vcmask 261120  }
  0x39   : > { %v673_v1 = vld [vmem:[%s2225_s16] sm:$0xff] }
  0x3a   : > { %v674_v2 = vadd.f32 %v673_v1, %v672_v0 }
  0x3c   : > { %676 = vst.msk [vmem:[%s1992_s30] sm:$0xff] %vm675_vm0, %v674_v2 }
  0x3d PF: > { %vm680_vm1 = vcmask 261120   ;;  %v1772_v5 = vmov 32.0   ;;  %v1548_v17 = vld [vmem:[%s1950_s1 + $0x8] sm:$0xff]  ;;  %v1547_v18 = vld [vmem:[%s1950_s1] sm:$0xff]  ;;  %s2226_s1 = scalar_lea.vmem %s2169_s2, %s1933_s26  ;;  %s2227_s24 = scalar_lea.vmem %s2170_s3, %s1933_s26  ;;  %vm795_vm6 = vcmask 64512   ;;  %vm940_vm8 = vcmask 1043456  }
  0x3e   : > { %1650 = vrcp.f32 %v1772_v5  ;;  %748 = vmatpush.bf16.msra.mxu0 %v1548_v17  ;;  %v1642_v28 = vld [vmem:[%s2226_s1] ss:$0 sm:$0xff]  ;;  %s2228_s22 = scalar_lea.vmem %s2172_s5, %s1933_s26  ;;  %s1773_s14 = smov 104   ;;  %vm1033_vm9 = vcmask 130048   ;;  %vm1035_vm10 = vcmask 195584  }
  0x3f   : > { %v1643_v31 = vld [vmem:[%s2227_s24] ss:$0 sm:$0xff]  ;;  %s1774_s20 = smov 120   ;;  %s1775_s17 = smov 112  }
  0x40   : > { %v1644_v35 = vld [vmem:[%s2228_s22] ss:$0 sm:$0xff]  ;;  %s1776_s4 = smov 96   ;;  %s1778_s25 = smov 64  }
  0x41   : > { %s1779_s16 = smov 8   ;;  %s1780_s6 = smov 24  }
  0x42   : > { %749 = vmatpush.bf16.msra.mxu0 %v1547_v18  ;;  %s1781_s15 = smov 16   ;;  %s2229_s23 = scalar_lea.vmem %s2174_s7, %s1933_s26 }
  0x43   : > { %v2000_v3 = vld [vmem:[%s1992_s30] sm:$0xff]  ;;  %s2230_s24 = sld [smem:[#allocation22_spill]] }
  0x44   : > { %v681_v4 = vsel %vm680_vm1, %v2000_v3, 0.0  ;;  %v1651_v6 = vpop.eup %1650 }
  0x45   : > { %682 = vadd.xlane.f32.xlu0 %v681_v4  ;;  %v685_v7 = vmul.f32 32.0, %v1651_v6  ;;  %vm689_vm2 = vweird.f32 %v1651_v6 }
  0x47   : > { %v686_v8 = vsub.f32 1.0, %v685_v7  ;;  %v755_v7 = vlaneseq }
  0x49   : > { %v687_v9 = vmul.f32 %v1651_v6, %v686_v8  ;;  %v756_v8 = vshrl.u32 %v755_v7, 7  ;;  %s2231_s27 = scalar_lea.vmem %s2230_s24, %s1933_s26 }
  0x4b   : > { %v688_v10 = vadd.f32 %v1651_v6, %v687_v9  ;;  %v758_v9 = vand.u32 127, %v755_v7 }
  0x4d   : > { %v2004_v11 = vsel %vm689_vm2, %v1651_v6, %v688_v10  ;;  %vm759_vm7 = vcmp.gt.s32.totalorder %v758_v9, %v756_v8  ;;  %v1777_v10 = vmov 0.0  }
  0xb8   : > { %v683_v12 = vpop.xlane.xlu0 %682 }
  0xb9   : > { %v691_v13 = vmul.f32 %v2004_v11, %v683_v12  ;;  %v760_v12 = vsel %vm759_vm7, -1e+09, %v1777_v10 }
  0xbb   : > { %v692_v14 = vsub.f32 %v2000_v3, %v691_v13 }
  0xbd   : > { %v693_v15 = vmul.f32 %v692_v14, %v692_v14 }
  0xbf   : > { %v694_v16 = vsel %vm680_vm1, %v693_v15, 0.0 }
  0xc0   : > { %695 = vadd.xlane.f32.xlu0 %v694_v16 }
 0x133   : > { %v696_v19 = vpop.xlane.xlu0 %695 }
 0x134   : > { %v697_v20 = vmul.f32 %v696_v19, %v2004_v11 }
 0x136   : > { %v698_v21 = vadd.f32 1e-05, %v697_v20 }
 0x138   : > { %1652 = vrsqrt.f32 %v698_v21  ;;  %vm705_vm4 = vweird.f32 %v698_v21 }
 0x13e   : > { %v1653_v22 = vpop.eup %1652 }
 0x13f   : > { %v700_v23 = vmul.f32 %v1653_v22, %v698_v21  ;;  %vm706_vm3 = vweird.f32 %v1653_v22 }
 0x140   : > { %vm707_vm5 = vmor %vm705_vm4, %vm706_vm3 }
 0x141   : > { %v701_v24 = vmul.f32 %v1653_v22, %v700_v23 }
 0x143   : > { %v702_v25 = vmul.f32 0.5, %v701_v24 }
 0x145   : > { %v703_v26 = vsub.f32 1.5, %v702_v25 }
 0x147   : > { %v704_v27 = vmul.f32 %v1653_v22, %v703_v26 }
 0x149   : > { %v708_v29 = vsel %vm707_vm5, %v1653_v22, %v704_v27 }
 0x14a   : > { %v709_v30 = vmul.f32 %v708_v29, %v692_v14 }
 0x14c   : > { %v713_v32 = vmul.f32 %v1642_v28, %v709_v30 }
 0x14e   : > { %v717_v33 = vadd.f32 %v1643_v31, %v713_v32 }
 0x150   : > { %v718_v34 = vpack.c.bf16 %v717_v33, %v717_v33 }
 0x152   : > { %1479 = vmatmul.msk.bf16.vlgmr.msra.gmra.mxu0 %vm680_vm1, %v718_v34 }
 0x1cf   : > { %v751_v36 = vpop.f32.mrf.mxu0 }
 0x1d0   : > { %v752_v37 = vadd.f32 %v1644_v35, %v751_v36 }
 0x1d2   : > { %783 = vrot.lane.b32.xlu2 %v752_v37, %s1773_s14  ;;  %777 = vrot.lane.b32.xlu1 %v752_v37, %s1774_s20  ;;  %v761_v39 = vmul.f32 0.35355338, %v752_v37  ;;  %v786_v44 = vpack.c.bf16 %v752_v37, %v752_v37 }
 0x1d4   : > { %v791_v45 = vunpack.c.l.b16 %v786_v44  ;;  %v772_v0 = vpack.c.bf16 %v761_v39, %v761_v39 }
 0x1d6   : > { %v2032_v46 = vpack.c.b16 %v791_v45, %v791_v45 }
 0x1d7   : > { %v753_v38 = vpop.f32.mrf.mxu0 }
 0x1da   : > { %780 = vrot.lane.b32.xlu1 %v752_v37, %s1775_s17 }
 0x1e2   : > { %763 = vrot.lane.b32.xlu1 %v761_v39, %s1774_s20  ;;  %s2232_s20 = sld [smem:[#allocation9_spill]] }
 0x22c   : > { %v784_v40 = vpop.permute.xlu2 %783 }
 0x22d   : > { %v789_v41 = vpack.c.bf16 %v784_v40, %v784_v40 }
 0x22f   : > { %v864_v42 = vunpack.c.l.b16 %v789_v41 }
 0x231   : > { %v2029_v43 = vpack.c.b16 %v864_v42, %v864_v42 }
 0x233   : > { %866 = vrot.lane.b32.xlu1 %v2029_v43, %s1776_s4 }
 0x23b   : > { %793 = vrot.lane.b32.xlu1 %v2032_v46, %s1776_s4 }
 0x244   : > { %v778_v47 = vpop.permute.xlu1 %777 }
 0x245   : > { %v787_v48 = vpack.c.bf16 %v778_v47, %v778_v47 }
 0x247   : > { %v816_v49 = vunpack.c.l.b16 %v787_v48 }
 0x249   : > { %v2035_v50 = vpack.c.b16 %v816_v49, %v816_v49 }
 0x24b   : > { %818 = vrot.lane.b32.xlu2 %v2035_v50, %s1776_s4 }
 0x24c   : > { %v781_v51 = vpop.permute.xlu1 %780 }
 0x24d   : > { %v788_v52 = vpack.c.bf16 %v781_v51, %v781_v51 }
 0x24f   : > { %v840_v53 = vunpack.c.l.b16 %v788_v52 }
 0x251   : > { %v2038_v54 = vpack.c.b16 %v840_v53, %v840_v53 }
 0x253   : > { %842 = vrot.lane.b32.xlu0 %v2038_v54, %s1776_s4  ;;  %766 = vrot.lane.b32.xlu2 %v761_v39, %s1775_s17 }
 0x254   : > { %v764_v55 = vpop.permute.xlu1 %763 }
 0x255   : > { %v773_v60 = vpack.c.bf16 %v764_v55, %v764_v55 }
 0x25b   : > { %769 = vrot.lane.b32.xlu2 %v761_v39, %s1773_s14 }
 0x2a5   : > { %v819_v56 = vpop.permute.xlu2 %818  ;;  %v867_v57 = vpop.permute.xlu1 %866 }
 0x2a6   : > { %v824_v58 = vsel %vm795_vm6, %v819_v56, 0  ;;  %v872_v59 = vsel %vm795_vm6, %v867_v57, 0 }
 0x2a7   : > { %833 = vmatpush.bf16.xpose.msra.mxu2 %v824_v58  ;;  %881 = vmatpush.bf16.xpose.msrb.mxu0 %v872_v59 }
 0x2ad   : > { %v767_v61 = vpop.permute.xlu2 %766  ;;  %v794_v62 = vpop.permute.xlu1 %793 }
 0x2ae   : > { %1481 = vmatmul.msk.bf16.vlgmr.msra.gmra.mxu2 %vm795_vm6, %v773_v60  ;;  %v800_v63 = vsel %vm795_vm6, %v794_v62, 0  ;;  %v774_v6 = vpack.c.bf16 %v767_v61, %v767_v61 }
 0x2af   : > { %809 = vmatpush.bf16.xpose.msra.mxu1 %v800_v63 }
 0x2b5   : > { %v770_v1 = vpop.permute.xlu2 %769 }
 0x2b6   : > { %v775_v2 = vpack.c.bf16 %v770_v1, %v770_v1  ;;  %1480 = vmatmul.msk.bf16.vlgmr.msra.gmra.mxu1 %vm795_vm6, %v772_v0 }
 0x2b8   : > { %1483 = vmatmul.msk.bf16.vlgmr.msrb.gmra.mxu0 %vm795_vm6, %v775_v2 }
 0x2c5   : > { %v843_v4 = vpop.permute.xlu0 %842 }
 0x2c6   : > { %v848_v5 = vsel %vm795_vm6, %v843_v4, 0 }
 0x2c7   : > { %857 = vmatpush.bf16.xpose.msra.mxu3 %v848_v5 }
 0x2ce   : > { %1482 = vmatmul.msk.bf16.vlgmr.msra.gmra.mxu3 %vm795_vm6, %v774_v6 }
 0x331   : > { %v835_v13 = vpop.f32.mrf.mxu2 }
 0x332   : > { %v836_v14 = vadd.f32 %v835_v13, %v760_v12 }
 0x333   : > { %v811_v15 = vpop.f32.mrf.mxu1 }
 0x334   : > { %v890_v16 = vsel %vm795_vm6, %v836_v14, -inf  ;;  %v812_v19 = vadd.f32 %v811_v15, %v760_v12 }
 0x335   : > { %891 = vmax.xlane.f32.xlu2 %v890_v16  ;;  %v883_v17 = vpop.f32.mrf.mxu0 }
 0x336   : > { %v884_v18 = vadd.f32 %v883_v17, %v760_v12  ;;  %v887_v23 = vsel %vm795_vm6, %v812_v19, -inf }
 0x338   : > { %v896_v20 = vsel %vm795_vm6, %v884_v18, -inf }
 0x339   : > { %v837_v21 = vpop.f32.mrf.mxu2  ;;  %897 = vmax.xlane.f32.xlu1 %v896_v20  ;;  %v1549_v20 = vld [vmem:[%s1959_s28] sm:$0xff] }
 0x33b   : > { %v813_v22 = vpop.f32.mrf.mxu1 }
 0x33d   : > { %v885_v24 = vpop.f32.mrf.mxu0  ;;  %888 = vmax.xlane.f32.xlu2 %v887_v23 }
 0x351   : > { %v859_v25 = vpop.f32.mrf.mxu3 }
 0x352   : > { %v860_v26 = vadd.f32 %v859_v25, %v760_v12 }
 0x354   : > { %v893_v27 = vsel %vm795_vm6, %v860_v26, -inf }
 0x355   : > { %894 = vmax.xlane.f32.xlu0 %v893_v27 }
 0x359   : > { %v861_v28 = vpop.f32.mrf.mxu3 }
 0x35a   : > { %v1645_v28 = vld [vmem:[%s2229_s23] ss:$0 sm:$0xff]  ;;  %s1262_s23 = sshll.u32 %s1992_s30, 4  ;;  %s1263_s23 = int_to_ptr.vmem [resolvable:$true] %s1262_s23 }
 0x3a8   : > { %v892_v29 = vpop.xlane.xlu2 %891 }
 0x3a9   : > { %v900_v30 = vsub.f32 %v836_v14, %v892_v29 }
 0x3ab   : > { %v905_v31 = vmul.f32 1.442695, %v900_v30 }
 0x3ac   : > { %v898_v32 = vpop.xlane.xlu1 %897 }
 0x3ad   : > { %1654 = vpow2.f32 %v905_v31  ;;  %v902_v33 = vsub.f32 %v884_v18, %v898_v32 }
 0x3af   : > { %v909_v34 = vmul.f32 1.442695, %v902_v33 }
 0x3b0   : > { %v889_v45 = vpop.xlane.xlu2 %888 }
 0x3b1   : > { %1656 = vpow2.f32 %v909_v34  ;;  %v899_v47 = vsub.f32 %v812_v19, %v889_v45  ;;  %v1550_v19 = vld [vmem:[%s1959_s28 + $0x8] sm:$0xff] }
 0x3b3   : > { %v1655_v35 = vpop.eup %1654  ;;  %v903_v48 = vmul.f32 1.442695, %v899_v47 }
 0x3b4   : > { %v914_v36 = vsel %vm795_vm6, %v1655_v35, 0.0 }
 0x3b5   : > { %915 = vadd.xlane.f32.xlu0 %v914_v36 }
 0x3b7   : > { %v1657_v37 = vpop.eup %1656 }
 0x3b8   : > { %v920_v38 = vsel %vm795_vm6, %v1657_v37, 0.0 }
 0x3b9   : > { %921 = vadd.xlane.f32.xlu1 %v920_v38 }
 0x3c8   : > { %v895_v39 = vpop.xlane.xlu0 %894 }
 0x3c9   : > { %v901_v40 = vsub.f32 %v860_v26, %v895_v39  ;;  %957 = vrot.lane.b32.xlu0 %v2035_v50, %s1778_s25  ;;  %v1552_v39 = vld [vmem:[%s1976_s18 + $0x8] sm:$0xff] }
 0x3cb   : > { %v907_v41 = vmul.f32 1.442695, %v901_v40  ;;  %v1551_v40 = vld [vmem:[%s1976_s18] sm:$0xff] }
 0x3cd   : > { %1658 = vpow2.f32 %v907_v41 }
 0x3ce   : > { %1660 = vpow2.f32 %v903_v48 }
 0x3d2   : > { %999 = vrot.lane.b32.xlu1 %v2029_v43, %s1778_s25 }
 0x3d3   : > { %v1659_v42 = vpop.eup %1658 }
 0x3d4   : > { %v917_v44 = vsel %vm795_vm6, %v1659_v42, 0.0  ;;  %v1661_v49 = vpop.eup %1660 }
 0x3d5   : > { %918 = vadd.xlane.f32.xlu2 %v917_v44  ;;  %v911_v51 = vsel %vm795_vm6, %v1661_v49, 0.0 }
 0x3ed   : > { %978 = vrot.lane.b32.xlu2 %v2038_v54, %s1778_s25 }
 0x3f3   : > { %912 = vadd.xlane.f32.xlu0 %v911_v51 }
 0x3f5   : > { %935 = vrot.lane.b32.xlu2 %v2032_v46, %s1778_s25 }
 0x428   : > { %v916_v50 = vpop.xlane.xlu0 %915 }
 0x429   : > { %1662 = vrcp.f32 %v916_v50  ;;  %v1646_v50 = vld [vmem:[%s2231_s27] ss:$0 sm:$0xff] }
 0x42c   : > { %v922_v43 = vpop.xlane.xlu1 %921 }
 0x42d   : > { %1664 = vrcp.f32 %v922_v43  ;;  %v1647_v43 = vld [vmem:[%s650_s0] ss:$0 sm:$0xff] }
 0x42f   : > { %v1663_v52 = vpop.eup %1662 }
 0x430   : > { %v928_v53 = vmul.f32 %v1663_v52, %v1655_v35 }
 0x432   : > { %v932_v57 = vpack.c.bf16 %v928_v53, %v928_v53 }
 0x433   : > { %v1665_v58 = vpop.eup %1664 }
 0x434   : > { %v930_v54 = vmul.f32 %v1665_v58, %v1657_v37  ;;  %v1559_v58 = vld [vmem:[%s1990_s8 + $0x30] sm:$0xff] }
 0x436   : > { %v934_v46 = vpack.c.bf16 %v930_v54, %v930_v54  ;;  %v1558_v54 = vld [vmem:[%s1990_s8 + $0x28] sm:$0xff] }
 0x43b   : > { %v958_v55 = vpop.permute.xlu0 %957 }
 0x43c   : > { %v963_v56 = vsel %vm940_vm8, %v958_v55, 0 }
 0x43d   : > { %972 = vmatpush.bf16.msrb.mxu2 %v963_v56 }
 0x440   : > { %1485 = vmatmul.msk.bf16.vlgmr.msrb.gmra.mxu2 %vm795_vm6, %v932_v57  ;;  %v1560_v57 = vld [vmem:[%s1990_s8 + $0x38] sm:$0xff] }
 0x441   : > { %1137 = vmatpush.bf16.msra.mxu2 %v1552_v39 }
 0x444   : > { %v1000_v59 = vpop.permute.xlu1 %999 }
 0x445   : > { %v1005_v60 = vsel %vm940_vm8, %v1000_v59, 0  ;;  %1138 = vmatpush.bf16.msra.mxu2 %v1551_v40  ;;  %v1557_v59 = vld [vmem:[%s1990_s8 + $0x20] sm:$0xff] }
 0x446   : > { %1014 = vmatpush.bf16.msra.mxu0 %v1005_v60  ;;  %v1556_v60 = vld [vmem:[%s1990_s8 + $0x18] sm:$0xff] }
 0x448   : > { %v919_v61 = vpop.xlane.xlu2 %918 }
 0x449   : > { %1666 = vrcp.f32 %v919_v61  ;;  %1487 = vmatmul.msk.bf16.vlgmr.msra.gmra.mxu0 %vm795_vm6, %v934_v46  ;;  %v1555_v46 = vld [vmem:[%s1990_s8 + $0x10] sm:$0xff]  ;;  %v1554_v61 = vld [vmem:[%s1990_s8 + $0x8] sm:$0xff] }
 0x44f   : > { %v1667_v62 = vpop.eup %1666 }
 0x450   : > { %v929_v63 = vmul.f32 %v1667_v62, %v1659_v42  ;;  %v979_v0 = vpop.permute.xlu2 %978  ;;  %v1648_v62 = vld [vmem:[%s658_s12] ss:$0 sm:$0xff]  ;;  %s1540_s12 = sshll.u32 %s2232_s20, 3 }
 0x451   : > { %v984_v1 = vsel %vm940_vm8, %v979_v0, 0  ;;  %v1553_v0 = vld [vmem:[%s1990_s8] sm:$0xff]  ;;  %s2233_s8 = sld [smem:[#allocation6_spill]] }
 0x452   : > { %993 = vmatpush.bf16.msrb.mxu3 %v984_v1  ;;  %v933_v2 = vpack.c.bf16 %v929_v63, %v929_v63 }
 0x455   : > { %1486 = vmatmul.msk.bf16.vlgmr.msrb.gmra.mxu3 %vm795_vm6, %v933_v2 }
 0x456   : > { %1234 = vmatpush.bf16.msra.mxu3 %v1560_v57 }
 0x457   : > { %s2237_s18 = sand.u32 1, %s2233_s8  }
 0x458   : > { %v936_v4 = vpop.permute.xlu2 %935  ;;  %s1250_s24 = scalar_lea.sflag [#allocation3], %s2237_s18 }
 0x459   : > { %v942_v5 = vsel %vm940_vm8, %v936_v4, 0 }
 0x45a   : > { %951 = vmatpush.bf16.msrb.mxu1 %v942_v5  ;;  %1235 = vmatpush.bf16.msra.mxu3 %v1559_v58 }
 0x45e   : > { %1067 = vmatpush.bf16.msra.mxu1 %v1550_v19  ;;  %1236 = vmatpush.bf16.msra.mxu3 %v1558_v54 }
 0x462   : > { %1068 = vmatpush.bf16.msra.mxu1 %v1549_v20  ;;  %1237 = vmatpush.bf16.msra.mxu3 %v1557_v59 }
 0x466   : > { %v913_v6 = vpop.xlane.xlu0 %912  ;;  %1238 = vmatpush.bf16.msra.mxu3 %v1556_v60 }
 0x467   : > { %1668 = vrcp.f32 %v913_v6 }
 0x46a   : > { %1239 = vmatpush.bf16.msra.mxu3 %v1555_v46 }
 0x46d   : > { %v1669_v7 = vpop.eup %1668 }
 0x46e   : > { %v927_v8 = vmul.f32 %v1669_v7, %v1661_v49  ;;  %1240 = vmatpush.bf16.msra.mxu3 %v1554_v61 }
 0x470   : > { %v931_v9 = vpack.c.bf16 %v927_v8, %v927_v8 }
 0x472   : > { %1484 = vmatmul.msk.bf16.vlgmr.msrb.gmra.mxu1 %vm795_vm6, %v931_v9  ;;  %1241 = vmatpush.bf16.msra.mxu3 %v1553_v0 }
 0x4c3   : > { %v974_v10 = vpop.f32.mrf.mxu2 }
 0x4c4   : > { %1021 = vrot.lane.b32.xlu1 %v974_v10, %s1779_s16 }
 0x4c6   : > { %v1016_v12 = vpop.f32.mrf.mxu0 }
 0x4cb   : > { %v976_v13 = vpop.f32.mrf.mxu2 }
 0x4cc   : > { %1029 = vrot.lane.b32.xlu1 %v1016_v12, %s1780_s6 }
 0x4ce   : > { %v1018_v14 = vpop.f32.mrf.mxu0 }
 0x4d8   : > { %v995_v15 = vpop.f32.mrf.mxu3 }
 0x4d9   : > { %1025 = vrot.lane.b32.xlu2 %v995_v15, %s1781_s15  ;;  %s2235_s15 = sld [smem:[#allocation24_spill]] }
 0x4df   : > { %s2236_s1 = smov %s2235_s15  ;;  %s1260_s19 = scalar_lea.hbm %s2235_s15, %s1540_s12 }
 0x4e0   : > { %v997_v16 = vpop.f32.mrf.mxu3  ;;  %s1264_s28 = sshll.u32 %s1260_s19, 4  ;;  %s1696_s22 = scalar_lea.hbm %s2236_s1, 16  ;;  %s1265_s28 = int_to_ptr.hbm [resolvable:$true] %s1264_s28 }
 0x4e1   : > { %s1690_s27 = sshra.s32 %s1265_s28, 4  ;;  %s1691_s27 = int_to_ptr.hbm [resolvable:$true] %s1690_s27 }
 0x4e2   : > { %s1692_s26 = scalar_lea.hbm %s1691_s27, 8  ;;  %p1697_p5 = scmp.lt.s32.totalorder %s1691_s27, %s2236_s1 }
 0x4e3   : > { %p1693_p1 = scmp.ne.s32.totalorder %s1691_s27, %s1692_s26  ;;  %p1698_p6 = scmp.lt.s32.totalorder %s1696_s22, %s1692_s26 }
 0x4e5   : > { %p1694_p2 = pnand %p1693_p1, %p1906_p3  ;;  %p1699_p7 = por %p1698_p6, %p1697_p5 }
 0x4e7   : > { %p1695_p4 = pneg %p1694_p2 }
 0x4e9   : > { %p1700_p8 = pnand %p1699_p7, %p1695_p4 }
 0x4ef   : > { %v953_v17 = vpop.f32.mrf.mxu1 }
 0x4f7   : > { %v955_v18 = vpop.f32.mrf.mxu1 }
 0x533   : > { %v1026_v23 = vpop.permute.xlu2 %1025 }
 0x536   : > { %v1022_v21 = vpop.permute.xlu1 %1021 }
 0x537   : > { %v1032_v22 = vsel %vm795_vm6, %v953_v17, %v1022_v21  ;;  %v1649_v21 = vld [vmem:[%s666_s29] ss:$0 sm:$0xff] }
 0x538   : > { %v1034_v25 = vsel %vm1033_vm9, %v1032_v22, %v1026_v23 }
 0x53e   : > { %v1030_v24 = vpop.permute.xlu1 %1029 }
 0x53f   : > { %v1036_v26 = vsel %vm1035_vm10, %v1034_v25, %v1030_v24 }
 0x540   : > { %v1037_v27 = vpack.c.bf16 %v1036_v26, %v1036_v26 }
 0x542   : > { %1496 = vmatmul.msk.bf16.vlgmr.msra.gmra.mxu1 %vm680_vm1, %v1037_v27 }
 0x5bf   : > { %v1070_v29 = vpop.f32.mrf.mxu1 }
 0x5c0   : > { %v1071_v30 = vadd.f32 %v1645_v28, %v1070_v29 }
 0x5c2   : > { %v2080_v31 = vadd.f32 %v1071_v30, %v2000_v3 }
 0x5c4   : > { %v1077_v32 = vsel %vm680_vm1, %v2080_v31, 0.0 }
 0x5c5   : > { %1078 = vadd.xlane.f32.xlu2 %v1077_v32 }
 0x5c7   : > { %v1072_v33 = vpop.f32.mrf.mxu1 }
 0x638   : > { %v1079_v34 = vpop.xlane.xlu2 %1078 }
 0x639   : > { %v1080_v35 = vmul.f32 %v1079_v34, %v2004_v11 }
 0x63b   : > { %v1081_v36 = vsub.f32 %v2080_v31, %v1080_v35 }
 0x63d   : > { %v1082_v37 = vmul.f32 %v1081_v36, %v1081_v36 }
 0x63f   : > { %v1083_v38 = vsel %vm680_vm1, %v1082_v37, 0.0 }
 0x640   : > { %1084 = vadd.xlane.f32.xlu1 %v1083_v38 }
 0x6b3   : > { %v1085_v3 = vpop.xlane.xlu1 %1084 }
 0x6b4   : > { %v1086_v41 = vmul.f32 %v1085_v3, %v2004_v11 }
 0x6b6   : > { %v1087_v42 = vadd.f32 1e-05, %v1086_v41 }
 0x6b8   : > { %1670 = vrsqrt.f32 %v1087_v42  ;;  %vm1094_vm12 = vweird.f32 %v1087_v42 }
 0x6be   : > { %v1671_v44 = vpop.eup %1670 }
 0x6bf   : > { %v1089_v45 = vmul.f32 %v1671_v44, %v1087_v42  ;;  %vm1095_vm11 = vweird.f32 %v1671_v44 }
 0x6c0   : > { %vm1096_vm13 = vmor %vm1094_vm12, %vm1095_vm11 }
 0x6c1   : > { %v1090_v47 = vmul.f32 %v1671_v44, %v1089_v45 }
 0x6c3   : > { %v1091_v48 = vmul.f32 0.5, %v1090_v47 }
 0x6c5   : > { %v1092_v49 = vsub.f32 1.5, %v1091_v48 }
 0x6c7   : > { %v1093_v51 = vmul.f32 %v1671_v44, %v1092_v49 }
 0x6c9   : > { %v1097_v11 = vsel %vm1096_vm13, %v1671_v44, %v1093_v51 }
 0x6ca   : > { %v1098_v52 = vmul.f32 %v1097_v11, %v1081_v36 }
 0x6cc   : > { %v1102_v53 = vmul.f32 %v1646_v50, %v1098_v52 }
 0x6ce   : > { %v1106_v55 = vadd.f32 %v1647_v43, %v1102_v53 }
 0x6d0   : > { %v1107_v56 = vpack.c.bf16 %v1106_v55, %v1106_v55 }
 0x6d2   : > { %1505 = vmatmul.msk.bf16.vlgmr.msra.gmra.mxu2 %vm680_vm1, %v1107_v56 }
 0x755   : > { %v1140_v63 = vpop.f32.mrf.mxu2 }
 0x756   : > { %v1141_v1 = vadd.f32 %v1648_v62, %v1140_v63 }
 0x758   : > { %v1506_v2 = vmul.f32 -1.702, %v1141_v1 }
 0x75a   : > { %v1146_v4 = vmul.f32 1.442695, %v1506_v2 }
 0x75c   : > { %1672 = vpow2.f32 %v1146_v4 }
 0x75d   : > { %v1142_v5 = vpop.f32.mrf.mxu2 }
 0x762   : > { %v1673_v6 = vpop.eup %1672 }
 0x763   : > { %v1148_v7 = vadd.f32 1.0, %v1673_v6 }
 0x765   : > { %1674 = vrcp.f32 %v1148_v7  ;;  %v1160_v12 = vand.u32 2147483648, %v1148_v7  ;;  %v1158_v14 = vand.u32 2147483647, %v1148_v7  ;;  %vm1154_vm15 = vweird.f32 %v1148_v7 }
 0x767   : > { %v1161_v16 = vor.u32 1.1754944e-38, %v1160_v12  ;;  %vm1159_vm2 = vcmp.eq.f32.partialorder %v1158_v14, 8.507059e+37 }
 0x76b   : > { %v1675_v8 = vpop.eup %1674 }
 0x76c   : > { %v1150_v9 = vmul.f32 %v1675_v8, %v1148_v7  ;;  %vm1155_vm14 = vweird.f32 %v1675_v8 }
 0x76d   : > { %vm1156_vm0 = vmor %vm1154_vm15, %vm1155_vm14 }
 0x76e   : > { %v1151_v10 = vsub.f32 1.0, %v1150_v9 }
 0x770   : > { %v1152_v13 = vmul.f32 %v1675_v8, %v1151_v10 }
 0x772   : > { %v1153_v15 = vadd.f32 %v1675_v8, %v1152_v13 }
 0x774   : > { %v1157_v17 = vsel %vm1156_vm0, %v1675_v8, %v1153_v15 }
 0x775   : > { %v1162_v18 = vsel %vm1159_vm2, %v1161_v16, %v1157_v17 }
 0x776   : > { %v1164_v19 = vmul.f32 %v1162_v18, %v1141_v1 }
 0x778   : > { %v1165_v20 = vpack.c.bf16 %v1164_v19, %v1164_v19 }
 0x77a   : > { %1242 = vmatmul.bf16.vlgmr.msra.gmra.mxu3 %v1165_v20 }
 0x7fd   : > { %v1243_v22 = vpop.f32.mrf.mxu3 }
 0x7fe   : > { %v1244_v23 = vadd.f32 %v1649_v21, %v1243_v22 }
 0x800   : > { %v1247_v24 = vadd.f32 %v1244_v23, %v2080_v31 }
 0x802   : > { %1248 = vst.msk [vmem:[%s1992_s30] sm:$0xff] %vm680_vm1, %v1247_v24 }
 0x803   : > { %1703 = shalt.err (!%p1700_p8)
}
 0x804   : > { %1561 = dma.vmem_to_hbm [thread:$0]  (%p1906_p3), %s1263_s23, 128, %s1265_s28, %s1250_s24  }
 0x805   : > { %v1245_v25 = vpop.f32.mrf.mxu3 }
 0x806 PF: > { %s2238_s30 = sld [smem:[#allocation12_spill]] }
 0x807   : > { %s2239_s20 = sld [smem:[#allocation5_spill]] }
 0x80c   : > { %p1567_p10 = scmp.ge.s32.totalorder %s2238_s30, 2 }
 0x80d   : > { %s1276_s12 = sand.u32 1, %s2239_s20  }
 0x80e   : > { %p1564_p11 = pnand %p1567_p10, %p1916_p9  ;;  %s1277_s17 = scalar_lea.sflag [#allocation3], %s1276_s12 }
 0x810   : > { %p1565_p12 = pneg %p1564_p11 }
 0x812   : > { %1737 = dma.done.wait (%p1565_p12), %s1277_s17, 128  }
 0x813   : > { %1739 = vsyncadd (%p1565_p12), %s1277_s17, 4294967168  ;;  %s27_s20 = sadd.s32 1, %s2238_s30   ;;  %s2241_s29 = sld [smem:[#allocation6_spill]] }
 0x814   : > { %p24_p13 = scmp.ge.s32.totalorder %s27_s20, 6   ;;  %s2242_s30 = sld [smem:[#allocation7_spill]] }
 0x815   : > { %s2243_s15 = sld [smem:[#allocation17_spill]] }
 0x816   : > { %s2244_s16 = sld [smem:[#allocation10_spill]]  ;;  %26 = sbr.rel (!%p24_p13) target bundleno = 13 (0xd), region = 151 }
 0x817   : > { %s2245_s17 = sld [smem:[#allocation11_spill]] }
 0x818   : > { %s2246_s18 = sld [smem:[#allocation13_spill]] }
 0x819   : > { %s2247_s19 = sld [smem:[#allocation15_spill]] }
 0x81b   :  { %1283 = vsyncpa [#allocation3], 1 }
 0x81c   :  { %1285 = vsyncpa [#allocation3 + $0x1], 1 }

</bundles_post_ra>
